<compile_context>
chip_gen: v5e
topology: v5e:2x2
jax: 0.10.0
libtpu: 0.0.40
codegen_flags: <defaults>
</compile_context>

<pallas_src>
import jax
import jax.numpy as jnp
from jax.experimental import pallas as pl
from jax.experimental.pallas import tpu as pltpu


def _round_up(x: int, m: int) -> int:
    return (x + m - 1) // m * m


def _largest_divisor_leq(n: int, cap: int) -> int:
    """Largest divisor of n that is <= cap (falls back to 1)."""
    best = 1
    d = 1
    while d * d <= n:
        if n % d == 0:
            lo, hi = d, n // d
            if lo <= cap and lo > best:
                best = lo
            if hi <= cap and hi > best:
                best = hi
        d += 1
    return best


def _make_conv1d_kernel(compute_dtype):
    def kernel(x_ref, w_ref, b_ref, o_ref):
        # In-kernel cast to the MXU compute dtype (VPU work, hidden under the
        # MXU) avoids wrapper-side casts that would round-trip x / W via HBM.
        x = x_ref[...].astype(compute_dtype)
        w = w_ref[...].astype(compute_dtype)
        acc = jnp.dot(x, w, preferred_element_type=jnp.float32)   # MXU, f32 acc
        o_ref[...] = (acc + b_ref[...]).astype(o_ref.dtype)       # VPU bias add
    return kernel


def conv1d(x, weight, bias, *, tile_m=1024, tile_n=None, out_dtype=None,
           compute_dtype=jnp.bfloat16,
           vmem_budget_bytes=40 * 1024 * 1024,
           vmem_limit_bytes=48 * 1024 * 1024):
    """GPT-2 Conv1D forward: y = x @ W + b.

    Args:
      x:      (..., nx)
      weight: (nx, nf)
      bias:   (nf,)
      out_dtype: output dtype (default: x.dtype). Pass jnp.bfloat16 when the
        consumer accepts it to halve the output HBM writeback.
    Returns:
      (..., nf) in out_dtype.
    """
    nx, nf = weight.shape
    size_out = x.shape[:-1] + (nf,)
    out_dtype = x.dtype if out_dtype is None else jnp.dtype(out_dtype)

    x2d = x.reshape(-1, nx)          # glue reshape (no copy for contiguous x)
    m = x2d.shape[0]

    x_isz = jnp.dtype(x.dtype).itemsize
    w_isz = jnp.dtype(weight.dtype).itemsize
    o_isz = jnp.dtype(out_dtype).itemsize
    c_isz = jnp.dtype(compute_dtype).itemsize

    # Sublane alignment for the M (second-to-last) block dim.
    align = 16 if min(x_isz, o_isz, c_isz) <= 2 else 8

    # --- tile_n: divisor of the 128-padded nf, as large as the W VMEM budget
    # allows (=> n_tiles == 1 for all GPT-2 projections). K (= nx) stays
    # un-tiled, so no accumulator scratch / output revisit is needed.
    nf_pad = _round_up(nf, 128)
    n_units = nf_pad // 128
    # W cost per 128-lane unit: double-buffered HBM-dtype tile + bf16 copy.
    w_unit_bytes = nx * 128 * (2 * w_isz +
                               (c_isz if weight.dtype != compute_dtype else 0))
    w_budget = int(vmem_budget_bytes * 0.6)
    max_n_units = max(1, w_budget // max(w_unit_bytes, 1))
    if tile_n is not None:
        max_n_units = min(max_n_units, max(1, tile_n // 128))
    tn = 128 * _largest_divisor_leq(n_units, max_n_units)
    n_tiles = nf_pad // tn
    w_vmem = (tn // 128) * w_unit_bytes

    # --- tile_m: as large as the remaining VMEM budget allows, preferring a
    # divisor of M so x never needs a padded copy in HBM.
    m_pad = _round_up(m, align)

    def _m_vmem(tm):
        x_v = 2 * tm * nx * x_isz                       # double-buffered x tile
        x_c = tm * nx * c_isz if x.dtype != compute_dtype else 0
        o_v = 2 * tm * tn * o_isz                       # double-buffered out tile
        acc = tm * tn * 4                               # f32 matmul result
        return x_v + x_c + o_v + acc

    tm = min(tile_m, m_pad)
    tm = max(align, tm - tm % align)
    while tm > align and w_vmem + _m_vmem(tm) > vmem_budget_bytes:
        tm -= align
    if m_pad % tm != 0:
        tm_div = align * _largest_divisor_leq(m_pad // align, tm // align)
        if tm_div >= max(align, tm // 2):
            tm = tm_div                                 # avoid padding x entirely
    m_grid = _round_up(m_pad, tm)
    m_tiles = m_grid // tm

    # --- operand prep: only pad what is strictly necessary; never cast here.
    x_p = x2d
    if m_grid != m:
        x_p = jnp.pad(x_p, ((0, m_grid - m), (0, 0)))
    w_p = weight
    b_p = bias.astype(jnp.float32).reshape(1, nf)
    if nf_pad != nf:
        w_p = jnp.pad(w_p, ((0, 0), (0, nf_pad - nf)))
        b_p = jnp.pad(b_p, ((0, 0), (0, nf_pad - nf)))

    grid = (n_tiles, m_tiles)                 # N outer, M inner -> W tile reuse

    bytes_accessed = (n_tiles * m_grid * nx * x_isz    # x re-read once per N tile
                      + nx * nf_pad * w_isz            # each W tile fetched once
                      + nf_pad * 4                     # bias
                      + m_grid * nf_pad * o_isz)       # output writeback

    out = pl.pallas_call(
        _make_conv1d_kernel(compute_dtype),
        out_shape=jax.ShapeDtypeStruct((m_grid, nf_pad), out_dtype),
        grid_spec=pltpu.PrefetchScalarGridSpec(
            num_scalar_prefetch=0,
            grid=grid,
            in_specs=[
                # x tile: follows the inner M step; K un-tiled (GPT-2 nx<=3072).
                pl.BlockSpec((tm, nx), lambda j, i: (i, 0)),
                # W tile: constant across inner M steps -> DMA'd once per j.
                pl.BlockSpec((nx, tn), lambda j, i: (0, j)),
                # bias tile: follows the N tile.
                pl.BlockSpec((1, tn), lambda j, i: (0, j)),
            ],
            out_specs=pl.BlockSpec((tm, tn), lambda j, i: (i, j)),
        ),
        compiler_params=pltpu.CompilerParams(
            # Both axes are independent; on v7x the compiler shards a parallel
            # axis across the two TensorCores (with n_tiles==1 that's the
            # M axis, which splits evenly).
            dimension_semantics=("parallel", "parallel"),
            vmem_limit_bytes=vmem_limit_bytes),
        cost_estimate=pl.CostEstimate(
            flops=2 * m_grid * nx * nf_pad,
            transcendentals=0,
            bytes_accessed=bytes_accessed),
    )(x_p, w_p, b_p)

    out = out[:m, :nf]
    return out.reshape(size_out)


if __name__ == "__main__":
    # Deterministic parameter init matching nn.init.normal_(w, std=0.02),
    # bias = zeros. Shapes: nx (input features) -> nf (output features).
    batch, seq, nx, nf = 2, 8, 32, 64

    key = jax.random.PRNGKey(0)
    kx, kw = jax.random.split(key)
    x = jax.random.normal(kx, (batch, seq, nx), dtype=jnp.float32)
    weight = 0.02 * jax.random.normal(kw, (nx, nf), dtype=jnp.float32)
    bias = jnp.zeros((nf,), dtype=jnp.float32)

    y = conv1d(x, weight, bias)
    y = jax.block_until_ready(y)
    assert y.shape == (batch, seq, nf)
    assert y.dtype == x.dtype

    # Reference with matching numerics (bf16 operands, f32 accumulation).
    x_bf = x.reshape(-1, nx).astype(jnp.bfloat16).astype(jnp.float32)
    w_bf = weight.astype(jnp.bfloat16).astype(jnp.float32)
    y_ref = (x_bf @ w_bf + bias).reshape(batch, seq, nf)
    assert jnp.allclose(y, y_ref, atol=1e-4, rtol=1e-4), \
        float(jnp.max(jnp.abs(y - y_ref)))

    # Sanity vs the full-precision addmm (looser tol covers the bf16 cast).
    y_full = (x.reshape(-1, nx) @ weight + bias).reshape(batch, seq, nf)
    assert jnp.allclose(y, y_full, atol=5e-3, rtol=5e-2)

    print("KERNEL_OK")
</pallas_src>

<mosaic_0001>
module attributes {stable_mosaic.version = 11 : i64} {
  func.func @kernel(%arg0: i32, %arg1: i32, %arg2: memref<16x32xf32, #tpu.memory_space<vmem>>, %arg3: memref<32x128xf32, #tpu.memory_space<vmem>>, %arg4: memref<1x128xf32, #tpu.memory_space<vmem>>, %arg5: memref<16x128xf32, #tpu.memory_space<vmem>>) attributes {dimension_semantics = [#tpu.dimension_semantics<parallel>, #tpu.dimension_semantics<parallel>], iteration_bounds = array<i64: 1, 1>, scalar_prefetch = 0 : i64, scratch_operands = 0 : i64, tpu.core_type = #tpu.core_type<tc>, window_params = [{transform_indices = @transform_0, window_bounds = array<i64: 16, 32>}, {transform_indices = @transform_1, window_bounds = array<i64: 32, 128>}, {transform_indices = @transform_2, window_bounds = array<i64: 1, 128>}, {transform_indices = @transform_3, window_bounds = array<i64: 16, 128>}]} {
    %c0 = arith.constant 0 : index
    %c0_0 = arith.constant 0 : index
    %0 = vector.load %arg2[%c0, %c0_0] : memref<16x32xf32, #tpu.memory_space<vmem>>, vector<16x32xf32>
    %1 = arith.truncf %0 : vector<16x32xf32> to vector<16x32xbf16>
    %c0_1 = arith.constant 0 : index
    %c0_2 = arith.constant 0 : index
    %2 = vector.load %arg3[%c0_1, %c0_2] : memref<32x128xf32, #tpu.memory_space<vmem>>, vector<32x128xf32>
    %3 = arith.truncf %2 : vector<32x128xf32> to vector<32x128xbf16>
    %cst = arith.constant dense<0.000000e+00> : vector<16x128xf32>
    %4 = tpu.matmul %1, %3, %cst {dimension_numbers = #tpu.dot_dimension_numbers<[1], [0], [0], [1], [0, 0, 1, 1], [], []>} : vector<16x32xbf16>, vector<32x128xbf16>, vector<16x128xf32> -> vector<16x128xf32>
    %c0_3 = arith.constant 0 : index
    %c0_4 = arith.constant 0 : index
    %5 = vector.load %arg4[%c0_3, %c0_4] : memref<1x128xf32, #tpu.memory_space<vmem>>, vector<1x128xf32>
    %6 = vector.broadcast %5 : vector<1x128xf32> to vector<16x128xf32>
    %7 = arith.addf %4, %6 : vector<16x128xf32>
    %c0_5 = arith.constant 0 : index
    %c0_6 = arith.constant 0 : index
    %8 = vector.load %arg5[%c0_5, %c0_6] : memref<16x128xf32, #tpu.memory_space<vmem>>, vector<16x128xf32>
    tpu.vector_store %arg5[%c0_5, %c0_6], %7 {strides = array<i32>} : memref<16x128xf32, #tpu.memory_space<vmem>>, vector<16x128xf32>,
    return
  }
  func.func @transform_0(%arg0: i32, %arg1: i32) -> (i32, i32) {
    %c0_i32 = arith.constant 0 : i32
    %c0_i32_0 = arith.constant 0 : i32
    return %arg1, %c0_i32 : i32, i32
  }
  func.func @transform_1(%arg0: i32, %arg1: i32) -> (i32, i32) {
    %c0_i32 = arith.constant 0 : i32
    %c0_i32_0 = arith.constant 0 : i32
    return %c0_i32, %arg0 : i32, i32
  }
  func.func @transform_2(%arg0: i32, %arg1: i32) -> (i32, i32) {
    %c0_i32 = arith.constant 0 : i32
    %c0_i32_0 = arith.constant 0 : i32
    return %c0_i32, %arg0 : i32, i32
  }
  func.func @transform_3(%arg0: i32, %arg1: i32) -> (i32, i32) {
    %c0_i32 = arith.constant 0 : i32
    return %arg1, %arg0 : i32, i32
  }
}

</mosaic_0001>

<bundles_post_ra>
// kernel: tpu_custom_call.1
= control target key start
LH: loop header
LB: loop body
LE: loop exit
PB: predicated region body
PF: predicated region fallthrough
CT: control target
= control target key end

     0   :  { %8 = vsyncpa [#allocation3], 0  ;;  %s232_s0 = inlined_call_operand.hbm [shape: f32[16,32], index: 0, kind: input, shape index: {}]   ;;  %s233_s1 = inlined_call_operand.hbm [shape: f32[32,128], index: 1, kind: input, shape index: {}]   ;;  %s234_s2 = inlined_call_operand.vmem [shape: f32[1,128], index: 2, kind: input, shape index: {}]   ;;  %s235_s3 = inlined_call_operand.hbm [shape: f32[16,128], index: 3, kind: output, shape index: {}]  }
   0x1   :  { %9 = vsyncpa [#allocation6], 0 }
   0x2   :  { %10 = vsyncpa [#allocation4], 0  ;;  %s15_s14 = sshll.u32 %s232_s0, 4  ;;  %s186_s15 = smov [#allocation2]   ;;  %s16_s14 = int_to_ptr.hbm [resolvable:$true] %s15_s14 }
   0x3   :  { %s17_s16 = sshll.u32 %s186_s15, 4  ;;  %s28_s19 = sshll.u32 %s233_s1, 4  ;;  %s18_s16 = int_to_ptr.vmem [resolvable:$true] %s17_s16  ;;  %s29_s19 = int_to_ptr.hbm [resolvable:$true] %s28_s19 }
   0x4   :  { %s187_s20 = smov 128   ;;  %s188_s21 = smov 8  }
   0x5   :  { %23 = dma.hbm_to_vmem [thread:$0]  %s16_s14, 256, %s18_s16, [#allocation3], %s187_s20, %s187_s20, %s188_s21  }
   0x6   :  { %s189_s22 = smov [#allocation5]  }
   0x7   :  { %s30_s23 = sshll.u32 %s189_s22, 4  ;;  %s31_s23 = int_to_ptr.vmem [resolvable:$true] %s30_s23 }
   0x8   :  { %36 = dma.hbm_to_vmem [thread:$0]  %s29_s19, 512, %s31_s23, [#allocation6], %s187_s20, %s187_s20, %s188_s21  }
   0x9   :  { %180 = dma.done.wait [#allocation3], 256  }
   0xa   :  { %181 = vsyncadd [#allocation3], 4294967040 }
   0xb   :  { %182 = dma.done.wait [#allocation6], 512  }
   0xc   :  { %183 = vsyncadd [#allocation6], 4294966784  ;;  %v53_v0 = vld [vmem:[#allocation5 + $0x10] sm:$0xff]  ;;  %v54_v1 = vld [vmem:[#allocation5 + $0x18] sm:$0xff]  ;;  %vm61_vm0 = vcmask 261120   ;;  %s190_s24 = smov [#allocation7]  }
   0xd   :  { %v51_v2 = vld [vmem:[#allocation5] sm:$0xff]  ;;  %v56_v3 = vpack.c.bf16 %v54_v1, %v53_v0  ;;  %v52_v4 = vld [vmem:[#allocation5 + $0x8] sm:$0xff]  ;;  %v48_v6 = vld [vmem:[#allocation2] sm:$0xff]  ;;  %s85_s25 = sshll.u32 %s190_s24, 4  ;;  %s87_s28 = sshll.u32 %s235_s3, 4  ;;  %s86_s25 = int_to_ptr.vmem [resolvable:$true] %s85_s25  ;;  %s88_s28 = int_to_ptr.hbm [resolvable:$true] %s87_s28 }
   0xe   :  { %v55_v5 = vpack.c.bf16 %v52_v4, %v51_v2  ;;  %v49_v7 = vld [vmem:[#allocation2 + $0x8] sm:$0xff]  ;;  %v107_v9 = vld [vmem:[%s234_s2] ss:$0 sm:$0xff] }
   0xf   :  { %71 = vmatpush.bf16.msra.mxu0 %v56_v3  ;;  %v50_v8 = vpack.c.bf16 %v49_v7, %v48_v6 }
  0x13   :  { %72 = vmatpush.bf16.msra.mxu0 %v55_v5 }
  0x16   :  { %101 = vmatmul.msk.bf16.vlgmr.msra.gmra.mxu0 %vm61_vm0, %v50_v8 }
  0x93   :  { %v74_v10 = vpop.f32.mrf.mxu0 }
  0x94   :  { %v75_v11 = vadd.f32 %v107_v9, %v74_v10 }
  0x96   :  { %79 = vst [vmem:[#allocation7] sm:$0xff] %v75_v11 }
  0x9b   :  { %v76_v12 = vpop.f32.mrf.mxu0 }
  0x9c   :  { %v77_v13 = vadd.f32 %v107_v9, %v76_v12 }
  0x9e   :  { %80 = vst [vmem:[#allocation7 + $0x8] sm:$0xff] %v77_v13 }
  0x9f   :  { %93 = dma.vmem_to_hbm [thread:$0]  %s86_s25, 256, %s88_s28, [#allocation4], %s187_s20, %s187_s20, %s188_s21  }
  0xa0   :  { %184 = dma.done.wait [#allocation4], 256  }
  0xa1   :  { %185 = vsyncadd [#allocation4], 4294967040 }
  0xa2   :  { %98 = vsyncpa [#allocation3], 1 }
  0xa3   :  { %99 = vsyncpa [#allocation6], 1 }
  0xa4   :  { %100 = vsyncpa [#allocation4], 1 }

</bundles_post_ra>
